<compile_context>
chip_gen: v7x
topology: tpu7x:2x2x1
jax: 0.10.0
libtpu: 0.0.40
codegen_flags: <defaults>
</compile_context>

<pallas_src>
import functools

import jax
import jax.numpy as jnp
import numpy as np
from jax.experimental import pallas as pl
from jax.experimental.pallas import tpu as pltpu


# ----------------------- per-generation VMEM sizing --------------------------
def _vmem_capacity_bytes():
    try:
        return int(pltpu.get_tpu_info().vmem_capacity_bytes)
    except Exception:
        return 64 * 1024 * 1024          # conservative (v7x-sized) fallback


_VMEM_CAP = _vmem_capacity_bytes()
_VMEM_LIMIT = min((_VMEM_CAP * 3) // 4, 96 * 1024 * 1024)   # scoped-VMEM request
_TILE_BUDGET = _VMEM_LIMIT // 4   # per-step (in + temp + out); x2 double-buffer headroom


def _tile_vmem_bytes(n_lead, rows, cols, dtype):
    """VMEM footprint of an (n_lead, rows, cols) tile incl. (sublane,lane) padding."""
    itemsize = jnp.dtype(dtype).itemsize
    sub = 8 * max(1, 4 // itemsize)          # f32: 8, bf16: 16, int8: 32 sublanes
    r = -(-rows // sub) * sub
    c = -(-cols // 128) * 128
    return n_lead * r * c * itemsize


def _pick_block(n, per_item_bytes):
    blk = max(1, min(n, _TILE_BUDGET // max(per_item_bytes, 1)))
    if n >= 2:
        blk = min(blk, -(-n // 2))           # >= 2 grid steps (both TCs on v7x)
    return blk


# ------------------------------ kernel helpers --------------------------------
def _flip_rows(strip, row_axis):
    """Reverse a tiny (h <= few) row strip; static sublane concat, no gather."""
    n = strip.shape[row_axis]
    if n <= 1:
        return strip
    parts = []
    for i in range(n - 1, -1, -1):
        idx = [slice(None)] * strip.ndim
        idx[row_axis] = slice(i, i + 1)
        parts.append(strip[tuple(idx)])
    return jnp.concatenate(parts, axis=row_axis)


def _write_circpad(x_ref, o_ref, H, W, h, w, lead, out_dtype):
    """Write the circular pad of x_ref directly into o_ref sub-slices.

    x_ref: Ref of shape (*lead_dims, H, W)
    o_ref: Ref (or Ref view) of shape (*lead_dims, H + 2h, W + 2w)

    Every row-band is sourced from register values (no read-back from o_ref):
    one interior-column store plus two wrap-column stores per band.
    """
    pre = (slice(None),) * lead
    row_axis = lead                    # == ndim - 2
    half = W // 2                      # W even => roll(+W//2) == roll(-W//2)

    def store_band(row0, nrows, strip):
        rows = slice(row0, row0 + nrows)
        o_ref[pre + (rows, slice(w, w + W))] = strip
        if w > 0:
            o_ref[pre + (rows, slice(0, w))] = \
                strip[pre + (slice(None), slice(W - w, W))]
            o_ref[pre + (rows, slice(W + w, W + 2 * w))] = \
                strip[pre + (slice(None), slice(0, w))]

    # Interior rows.
    store_band(h, H, x_ref[...].astype(out_dtype))

    # Boundary rows: flip(rows) then roll(W//2) along lanes, width-wrapped too.
    if h > 0:
        top = x_ref[pre + (slice(0, h), slice(None))].astype(out_dtype)
        bot = x_ref[pre + (slice(H - h, H), slice(None))].astype(out_dtype)
        top = _flip_rows(jnp.roll(top, half, axis=-1), row_axis)
        bot = _flip_rows(jnp.roll(bot, half, axis=-1), row_axis)
        store_band(0, h, top)
        store_band(h + H, h, bot)


# ------------------------------- 2-D (NCHW) ----------------------------------
def _make_circpad2d_kernel(H, W, h, w):
    def kernel(x_ref, o_ref):
        # x_ref: (Nblk, H, W)  ->  o_ref: (Nblk, H+2h, W+2w)
        _write_circpad(x_ref, o_ref, H, W, h, w, lead=1, out_dtype=o_ref.dtype)
    return kernel


@functools.partial(jax.jit, static_argnums=(1, 2))
def circ_pad_2d(x, h, w):
    """x: (B, C, H, W) -> (B, C, H + 2h, W + 2w); matches CircPad.forward_2d."""
    B, C, H, W = x.shape
    assert H % 2 == 0 and W % 2 == 0
    assert h <= H and w <= W, "padding must not exceed the spatial dims"
    if h == 0 and w == 0:
        return x

    Ho, Wo = H + 2 * h, W + 2 * w
    N = B * C
    # Padding-aware accounting: input tile (x2: tile + live value) + output tile.
    per_img = (2 * _tile_vmem_bytes(1, H, W, x.dtype)
               + _tile_vmem_bytes(1, Ho, Wo, x.dtype))
    Nblk = _pick_block(N, per_img)
    # TODO(synk): add an H-row tiling fallback if a single image ever exceeds
    # the per-step budget (irrelevant at these shapes).

    xf = x.reshape(N, H, W)
    raw_bytes = N * (H * W + Ho * Wo) * jnp.dtype(x.dtype).itemsize
    out = pl.pallas_call(
        _make_circpad2d_kernel(H, W, h, w),
        out_shape=jax.ShapeDtypeStruct((N, Ho, Wo), x.dtype),
        grid_spec=pltpu.PrefetchScalarGridSpec(
            num_scalar_prefetch=0,
            grid=(pl.cdiv(N, Nblk),),
            in_specs=[pl.BlockSpec((Nblk, H, W), lambda i: (i, 0, 0))],
            out_specs=pl.BlockSpec((Nblk, Ho, Wo), lambda i: (i, 0, 0)),
        ),
        compiler_params=pltpu.CompilerParams(
            dimension_semantics=("parallel",),
            vmem_limit_bytes=_VMEM_LIMIT),
        cost_estimate=pl.CostEstimate(
            flops=0, transcendentals=0, bytes_accessed=raw_bytes),
    )(xf)
    return out.reshape(B, C, Ho, Wo)


# ------------------------------ 3-D (NCDHW) -----------------------------------
def _make_circpad3d_kernel(D, H, W, d):
    Ho, Wo = H + 2 * d, W + 2 * d

    def kernel(x_ref, o_ref):
        # x_ref: (Cblk, D, H, W)  ->  o_ref: (Cblk, D+2d, Ho, Wo) float32.
        cblk = o_ref.shape[0]
        zeros = jnp.zeros((cblk, d, Ho, Wo), o_ref.dtype)
        o_ref[:, 0:d, :, :] = zeros                     # depth zero-pad (front)
        o_ref[:, D + d:D + 2 * d, :, :] = zeros         # depth zero-pad (back)
        # Each interior depth slice gets exactly the 2-D circular pad (h=w=d),
        # with the f32 upcast fused into the stores.
        _write_circpad(x_ref, o_ref.at[:, d:d + D, :, :], H, W, d, d,
                       lead=2, out_dtype=o_ref.dtype)

    return kernel


@functools.partial(jax.jit, static_argnums=(1,))
def circ_pad_3d(x, d):
    """x: (B, C, D, H, W) -> (B, C, D+2d, H+2d, W+2d) float32; matches forward_3d."""
    B, C, D, H, W = x.shape
    assert H % 2 == 0 and W % 2 == 0
    assert d <= H and d <= W, "padding must not exceed the spatial dims"
    if d == 0:
        return x.astype(jnp.float32)

    Dt, Ho, Wo = D + 2 * d, H + 2 * d, W + 2 * d
    N = B * C
    per_item = (_tile_vmem_bytes(D, H, W, x.dtype)             # input tile
                + _tile_vmem_bytes(D, H, W, jnp.float32)       # fused f32 upcast temp
                + _tile_vmem_bytes(Dt, Ho, Wo, jnp.float32))   # output tile
    Cblk = _pick_block(N, per_item)

    xf = x.reshape(N, D, H, W)
    raw_bytes = N * (D * H * W * jnp.dtype(x.dtype).itemsize + Dt * Ho * Wo * 4)
    out = pl.pallas_call(
        _make_circpad3d_kernel(D, H, W, d),
        out_shape=jax.ShapeDtypeStruct((N, Dt, Ho, Wo), jnp.float32),
        grid_spec=pltpu.PrefetchScalarGridSpec(
            num_scalar_prefetch=0,
            grid=(pl.cdiv(N, Cblk),),
            in_specs=[pl.BlockSpec((Cblk, D, H, W), lambda i: (i, 0, 0, 0))],
            out_specs=pl.BlockSpec((Cblk, Dt, Ho, Wo), lambda i: (i, 0, 0, 0)),
        ),
        compiler_params=pltpu.CompilerParams(
            dimension_semantics=("parallel",),
            vmem_limit_bytes=_VMEM_LIMIT),
        cost_estimate=pl.CostEstimate(
            flops=0, transcendentals=0, bytes_accessed=raw_bytes),
    )(xf)
    return out.reshape(B, C, Dt, Ho, Wo)


class CircPadPallas:
    """Drop-in equivalent of utils.layers.CircPad (no learnable params)."""

    def __init__(self, padding):
        if isinstance(padding, int):
            self.h = padding
            self.w = padding
        else:
            self.h = padding[0]
            self.w = padding[1]

    def __call__(self, x):
        if x.ndim == 4:
            return circ_pad_2d(x, self.h, self.w)
        elif x.ndim == 5:
            assert self.h == self.w
            return circ_pad_3d(x, self.h)
        else:
            raise ValueError("CircPad expects a 4-D or 5-D input")


# ----------------------------- reference (numpy) -----------------------------
def _ref_circ_pad_2d(x, h, w):
    x = np.asarray(x)
    B, C, H, W = x.shape
    if h == 0 and w == 0:
        return x
    if h > 0:
        up = np.roll(x[:, :, :h][:, :, ::-1], W // 2, axis=-1)
        down = np.roll(x[:, :, -h:][:, :, ::-1], W // 2, axis=-1)
        mid = np.concatenate([up, x, down], axis=2)
    else:
        mid = x
    if w > 0:
        out = np.concatenate([mid[..., -w:], mid, mid[..., :w]], axis=-1)
    else:
        out = mid
    return out


if __name__ == "__main__":
    key = jax.random.PRNGKey(0)

    # ---- 2-D (NCHW) path ----
    B, C, H, W = 2, 4, 16, 16
    x2 = jax.random.normal(key, (B, C, H, W), dtype=jnp.float32)
    pad2 = CircPadPallas((2, 3))
    y2 = jax.block_until_ready(pad2(x2))
    assert y2.shape == (B, C, H + 4, W + 6)
    ref2 = _ref_circ_pad_2d(np.asarray(x2), 2, 3)
    np.testing.assert_allclose(np.asarray(y2), ref2, rtol=0, atol=0)

    # ---- 3-D (NCDHW) path (fused depth zero-pad + f32 upcast) ----
    k2 = jax.random.PRNGKey(1)
    Bd, Cd, D, Hd, Wd = 2, 3, 4, 8, 8
    x3 = jax.random.normal(k2, (Bd, Cd, D, Hd, Wd), dtype=jnp.float32)
    pad3 = CircPadPallas(2)
    y3 = jax.block_until_ready(pad3(x3))
    assert y3.shape == (Bd, Cd, D + 4, Hd + 4, Wd + 4)
    z = np.zeros((Bd, Cd, 2, Hd, Wd), np.float32)
    flat = np.concatenate([z, np.asarray(x3), z], axis=2).reshape(
        Bd, Cd * (D + 4), Hd, Wd)
    ref3 = _ref_circ_pad_2d(flat, 2, 2).reshape(Bd, Cd, D + 4, Hd + 4, Wd + 4)
    np.testing.assert_allclose(np.asarray(y3), ref3, rtol=0, atol=0)

    print("KERNEL_OK")
</pallas_src>

<mosaic_0001>
module attributes {stable_mosaic.version = 11 : i64} {
  func.func @kernel(%arg0: i32, %arg1: memref<4x16x16xf32, #tpu.memory_space<vmem>>, %arg2: memref<4x20x22xf32, #tpu.memory_space<vmem>>) attributes {dimension_semantics = [#tpu.dimension_semantics<parallel>], iteration_bounds = array<i64: 2>, scalar_prefetch = 0 : i64, scratch_operands = 0 : i64, tpu.core_type = #tpu.core_type<tc>, window_params = [{transform_indices = @transform_0, window_bounds = array<i64: 4, 16, 16>}, {transform_indices = @transform_1, window_bounds = array<i64: 4, 20, 22>}]} {
    %c0 = arith.constant 0 : index
    %c0_0 = arith.constant 0 : index
    %c0_1 = arith.constant 0 : index
    %0 = vector.load %arg1[%c0, %c0_0, %c0_1] : memref<4x16x16xf32, #tpu.memory_space<vmem>>, vector<4x16x16xf32>
    %c0_2 = arith.constant 0 : index
    %c2 = arith.constant 2 : index
    %c3 = arith.constant 3 : index
    %1 = vector.load %arg2[%c0_2, %c2, %c3] : memref<4x20x22xf32, #tpu.memory_space<vmem>>, vector<4x16x16xf32>
    tpu.vector_store %arg2[%c0_2, %c2, %c3], %0 {strides = array<i32>} : memref<4x20x22xf32, #tpu.memory_space<vmem>>, vector<4x16x16xf32>,
    %2 = vector.extract_strided_slice %0 {offsets = [0, 0, 13], sizes = [4, 16, 3], strides = [1, 1, 1]} : vector<4x16x16xf32> to vector<4x16x3xf32>
    %c0_3 = arith.constant 0 : index
    %c2_4 = arith.constant 2 : index
    %c0_5 = arith.constant 0 : index
    %3 = vector.load %arg2[%c0_3, %c2_4, %c0_5] : memref<4x20x22xf32, #tpu.memory_space<vmem>>, vector<4x16x3xf32>
    tpu.vector_store %arg2[%c0_3, %c2_4, %c0_5], %2 {strides = array<i32>} : memref<4x20x22xf32, #tpu.memory_space<vmem>>, vector<4x16x3xf32>,
    %4 = vector.extract_strided_slice %0 {offsets = [0, 0, 0], sizes = [4, 16, 3], strides = [1, 1, 1]} : vector<4x16x16xf32> to vector<4x16x3xf32>
    %c0_6 = arith.constant 0 : index
    %c2_7 = arith.constant 2 : index
    %c19 = arith.constant 19 : index
    %5 = vector.load %arg2[%c0_6, %c2_7, %c19] : memref<4x20x22xf32, #tpu.memory_space<vmem>>, vector<4x16x3xf32>
    tpu.vector_store %arg2[%c0_6, %c2_7, %c19], %4 {strides = array<i32>} : memref<4x20x22xf32, #tpu.memory_space<vmem>>, vector<4x16x3xf32>,
    %c0_8 = arith.constant 0 : index
    %c0_9 = arith.constant 0 : index
    %c0_10 = arith.constant 0 : index
    %6 = vector.load %arg1[%c0_8, %c0_9, %c0_10] : memref<4x16x16xf32, #tpu.memory_space<vmem>>, vector<4x2x16xf32>
    %c0_11 = arith.constant 0 : index
    %c14 = arith.constant 14 : index
    %c0_12 = arith.constant 0 : index
    %7 = vector.load %arg1[%c0_11, %c14, %c0_12] : memref<4x16x16xf32, #tpu.memory_space<vmem>>, vector<4x2x16xf32>
    %8 = vector.extract_strided_slice %6 {offsets = [0, 0, 8], sizes = [4, 2, 8], strides = [1, 1, 1]} : vector<4x2x16xf32> to vector<4x2x8xf32>
    %9 = vector.extract_strided_slice %6 {offsets = [0, 0, 0], sizes = [4, 2, 8], strides = [1, 1, 1]} : vector<4x2x16xf32> to vector<4x2x8xf32>
    %10 = tpu.concatenate %8, %9 in 2 : vector<4x2x8xf32>, vector<4x2x8xf32> -> vector<4x2x16xf32>
    %11 = vector.extract_strided_slice %10 {offsets = [0, 1, 0], sizes = [4, 1, 16], strides = [1, 1, 1]} : vector<4x2x16xf32> to vector<4x1x16xf32>
    %12 = vector.extract_strided_slice %10 {offsets = [0, 0, 0], sizes = [4, 1, 16], strides = [1, 1, 1]} : vector<4x2x16xf32> to vector<4x1x16xf32>
    %13 = tpu.concatenate %11, %12 in 1 : vector<4x1x16xf32>, vector<4x1x16xf32> -> vector<4x2x16xf32>
    %14 = vector.extract_strided_slice %7 {offsets = [0, 0, 8], sizes = [4, 2, 8], strides = [1, 1, 1]} : vector<4x2x16xf32> to vector<4x2x8xf32>
    %15 = vector.extract_strided_slice %7 {offsets = [0, 0, 0], sizes = [4, 2, 8], strides = [1, 1, 1]} : vector<4x2x16xf32> to vector<4x2x8xf32>
    %16 = tpu.concatenate %14, %15 in 2 : vector<4x2x8xf32>, vector<4x2x8xf32> -> vector<4x2x16xf32>
    %17 = vector.extract_strided_slice %16 {offsets = [0, 1, 0], sizes = [4, 1, 16], strides = [1, 1, 1]} : vector<4x2x16xf32> to vector<4x1x16xf32>
    %18 = vector.extract_strided_slice %16 {offsets = [0, 0, 0], sizes = [4, 1, 16], strides = [1, 1, 1]} : vector<4x2x16xf32> to vector<4x1x16xf32>
    %19 = tpu.concatenate %17, %18 in 1 : vector<4x1x16xf32>, vector<4x1x16xf32> -> vector<4x2x16xf32>
    %c0_13 = arith.constant 0 : index
    %c0_14 = arith.constant 0 : index
    %c3_15 = arith.constant 3 : index
    %20 = vector.load %arg2[%c0_13, %c0_14, %c3_15] : memref<4x20x22xf32, #tpu.memory_space<vmem>>, vector<4x2x16xf32>
    tpu.vector_store %arg2[%c0_13, %c0_14, %c3_15], %13 {strides = array<i32>} : memref<4x20x22xf32, #tpu.memory_space<vmem>>, vector<4x2x16xf32>,
    %21 = vector.extract_strided_slice %13 {offsets = [0, 0, 13], sizes = [4, 2, 3], strides = [1, 1, 1]} : vector<4x2x16xf32> to vector<4x2x3xf32>
    %c0_16 = arith.constant 0 : index
    %c0_17 = arith.constant 0 : index
    %c0_18 = arith.constant 0 : index
    %22 = vector.load %arg2[%c0_16, %c0_17, %c0_18] : memref<4x20x22xf32, #tpu.memory_space<vmem>>, vector<4x2x3xf32>
    tpu.vector_store %arg2[%c0_16, %c0_17, %c0_18], %21 {strides = array<i32>} : memref<4x20x22xf32, #tpu.memory_space<vmem>>, vector<4x2x3xf32>,
    %23 = vector.extract_strided_slice %13 {offsets = [0, 0, 0], sizes = [4, 2, 3], strides = [1, 1, 1]} : vector<4x2x16xf32> to vector<4x2x3xf32>
    %c0_19 = arith.constant 0 : index
    %c0_20 = arith.constant 0 : index
    %c19_21 = arith.constant 19 : index
    %24 = vector.load %arg2[%c0_19, %c0_20, %c19_21] : memref<4x20x22xf32, #tpu.memory_space<vmem>>, vector<4x2x3xf32>
    tpu.vector_store %arg2[%c0_19, %c0_20, %c19_21], %23 {strides = array<i32>} : memref<4x20x22xf32, #tpu.memory_space<vmem>>, vector<4x2x3xf32>,
    %c0_22 = arith.constant 0 : index
    %c18 = arith.constant 18 : index
    %c3_23 = arith.constant 3 : index
    %25 = vector.load %arg2[%c0_22, %c18, %c3_23] : memref<4x20x22xf32, #tpu.memory_space<vmem>>, vector<4x2x16xf32>
    tpu.vector_store %arg2[%c0_22, %c18, %c3_23], %19 {strides = array<i32>} : memref<4x20x22xf32, #tpu.memory_space<vmem>>, vector<4x2x16xf32>,
    %26 = vector.extract_strided_slice %19 {offsets = [0, 0, 13], sizes = [4, 2, 3], strides = [1, 1, 1]} : vector<4x2x16xf32> to vector<4x2x3xf32>
    %c0_24 = arith.constant 0 : index
    %c18_25 = arith.constant 18 : index
    %c0_26 = arith.constant 0 : index
    %27 = vector.load %arg2[%c0_24, %c18_25, %c0_26] : memref<4x20x22xf32, #tpu.memory_space<vmem>>, vector<4x2x3xf32>
    tpu.vector_store %arg2[%c0_24, %c18_25, %c0_26], %26 {strides = array<i32>} : memref<4x20x22xf32, #tpu.memory_space<vmem>>, vector<4x2x3xf32>,
    %28 = vector.extract_strided_slice %19 {offsets = [0, 0, 0], sizes = [4, 2, 3], strides = [1, 1, 1]} : vector<4x2x16xf32> to vector<4x2x3xf32>
    %c0_27 = arith.constant 0 : index
    %c18_28 = arith.constant 18 : index
    %c19_29 = arith.constant 19 : index
    %29 = vector.load %arg2[%c0_27, %c18_28, %c19_29] : memref<4x20x22xf32, #tpu.memory_space<vmem>>, vector<4x2x3xf32>
    tpu.vector_store %arg2[%c0_27, %c18_28, %c19_29], %28 {strides = array<i32>} : memref<4x20x22xf32, #tpu.memory_space<vmem>>, vector<4x2x3xf32>,
    return
  }
  func.func @transform_0(%arg0: i32) -> (i32, i32, i32) {
    %c0_i32 = arith.constant 0 : i32
    %c0_i32_0 = arith.constant 0 : i32
    %c0_i32_1 = arith.constant 0 : i32
    return %arg0, %c0_i32, %c0_i32_0 : i32, i32, i32
  }
  func.func @transform_1(%arg0: i32) -> (i32, i32, i32) {
    %c0_i32 = arith.constant 0 : i32
    %c0_i32_0 = arith.constant 0 : i32
    %c0_i32_1 = arith.constant 0 : i32
    return %arg0, %c0_i32, %c0_i32_0 : i32, i32, i32
  }
}

</mosaic_0001>

<bundles_post_ra>
// kernel: circ_pad_2d.1
= control target key start
LH: loop header
LB: loop body
LE: loop exit
PB: predicated region body
PF: predicated region fallthrough
CT: control target
= control target key end

     0   :  { %6 = vsyncpa [#allocation3], 0  ;;  %s1014_s0 = inlined_call_operand.hbm [shape: f32[8,16,16], index: 0, kind: input, shape index: {}]   ;;  %s1015_s1 = inlined_call_operand.vmem [shape: f32[8,20,22], index: 1, kind: output, shape index: {}]  }
   0x1   :  { %8 = vsyncpa [#allocation3 + $0x1], 0  ;;  %s702_s6 = smov 0   ;;  %s704_s7 = smov 0  }
   0x2   :  { %s706_s8 = smov 0   ;;  %s708_s9 = smov 0  }
   0x3 LB: > { %s555_s10 = sadd.s32 4294967295, %s682_s9   ;;  %s722_s11 = sadd.s32 1, %s682_s9   ;;  %s682_s9 = sphi %s708_s9, %s1022_s9   ;;  %s678_s8 = sphi %s706_s8, %s1021_s8   ;;  %s674_s7 = sphi %s704_s7, %s1020_s7   ;;  %s670_s6 = sphi %s702_s6, %s1019_s6  }
   0x4   : > { %s18_s12 = ssub.s32 %s682_s9, %s722_s11  ;;  %s21_s13 = sadd.s32 1, %s678_s8 }
   0x5   : > { %p19_p0 = scmp.eq.s32.totalorder %s18_s12, 0  ;;  %p28_p1 = scmp.ne.s32.totalorder %s678_s8, %s674_s7 }
   0x6   : > { %p29_p2 = scmp.eq.s32.totalorder %s682_s9, 0  ;;  %p34_p3 = scmp.ne.s32.totalorder %s674_s7, %s670_s6 }
   0x7   : > { %s732_s14 = scalar_select %p19_p0, %s678_s8, %s21_s13  }
   0x8   : > { %p30_p4 = por %p29_p2, %p28_p1  ;;  %p35_p5 = scmp.eq.s32.totalorder %s555_s10, 0 }
   0x9   : > { %p578_p6 = scmp.lt.s32.totalorder %s682_s9, 2  ;;  %s84_s16 = sand.u32 1, %s678_s8  }
   0xa   : > { %p737_p7 = por %p35_p5, %p34_p3  ;;  %s559_s17 = sshll.u32 %s84_s16, 6 }
   0xb   : > { %s570_s18 = sshll.u32 %s682_s9, 10  ;;  %s88_s22 = scalar_lea.vmem [#allocation2], %s559_s17 }
   0xc   : > { %s746_s21 = scalar_lea.hbm %s1014_s0, %s570_s18  ;;  %s96_s23 = sshll.u32 %s88_s22, 4  ;;  %s748_s23 = int_to_ptr.vmem [resolvable:$true] %s96_s23 }
   0xd   : > { %p750_p8 = pnand %p578_p6, %p30_p4  ;;  %s755_s25 = scalar_lea.sflag [#allocation3], %s84_s16 }
   0xe   : > { %s618_s26 = scalar_lea.hbm %s746_s21, 1024  ;;  %s623_s29 = scalar_lea.hbm %s1014_s0, 2048 }
   0xf   : > { %p619_p10 = scmp.ne.s32.totalorder %s746_s21, %s618_s26  ;;  %p620_p11 = pneg %p750_p8 }
  0x10   : > { %p624_p0 = scmp.lt.u32.totalorder %s746_s21, %s1014_s0  ;;  %p625_p1 = scmp.lt.u32.totalorder %s623_s29, %s618_s26 }
  0x11   : > { %p621_p12 = pnand %p620_p11, %p619_p10  ;;  %p627_p3 = scmp.lt.u32.totalorder %s618_s26, %s746_s21 }
  0x12   : > { %p626_p2 = por %p625_p1, %p624_p0 }
  0x13   : > { %p622_p13 = pneg %p621_p12 }
  0x14   : > { %p628_p4 = por %p627_p3, %p626_p2 }
  0x16   : > { %p629_p5 = pnand %p628_p4, %p622_p13 }
  0x18   : > { %632 = shalt.err (!%p629_p5)
}
  0x19   : > { %s633_s3 = scalar_lea.vmem %s748_s23, 1024  ;;  %s684_s4 = smov [#allocation2]  }
  0x1a   : > { %p634_p6 = scmp.ne.s32.totalorder %s748_s23, %s633_s3  ;;  %s638_s5 = sshll.u32 %s684_s4, 4  ;;  %s639_s5 = int_to_ptr.vmem [resolvable:$false] %s638_s5 }
  0x1b   : > { %s640_s6 = scalar_lea.vmem %s639_s5, 2048  ;;  %p641_p9 = scmp.lt.s32.totalorder %s748_s23, %s639_s5 }
  0x1c   : > { %p636_p10 = pnand %p634_p6, %p620_p11  ;;  %p642_p0 = scmp.lt.s32.totalorder %s640_s6, %s633_s3 }
  0x1e   : > { %p637_p12 = pneg %p636_p10  ;;  %p643_p1 = por %p642_p0, %p641_p9 }
  0x20   : > { %p644_p2 = pnand %p643_p1, %p637_p12 }
  0x22   : > { %647 = shalt.err (!%p644_p2)
}
  0x23   : > { %s685_s12 = smov 128   ;;  %s686_s13 = smov 8  }
  0x24   : > { %577 = dma.hbm_to_vmem [thread:$0]  (!%p750_p8), %s746_s21, 1024, %s748_s23, %s755_s25, %s685_s12, %s685_s12, %s686_s13  }
  0x25   : > { %p104_p11 = scmp.lt.s32.totalorder %s682_s9, 3  ;;  %p1018_p13 = scmp.ge.s32.totalorder %s682_s9, 1 }
  0x27   : > { %p105_p3 = pnand %p1018_p13, %p104_p11 }
  0x28   : > { %s110_s16 = sand.u32 (!%p105_p3), 1, %s674_s7  }
  0x29   : > { %108 = sbr.rel (%p105_p3) target bundleno = 345 (0x159), region = 24  ;;  %s564_s17 = sshll.u32 (!%p105_p3), %s110_s16, 6 }
  0x2a   : > { %s111_s18 = scalar_lea.sflag (!%p105_p3), [#allocation3], %s110_s16  ;;  %s787_s19 = scalar_lea.vmem (!%p105_p3), [#allocation2], %s564_s17 }
  0x30   : > { %665 = dma.done.wait (%p737_p7), %s111_s18, 1024  }
  0x31   : > { %667 = vsyncadd (%p737_p7), %s111_s18, 4294966272  ;;  %v261_v0 = vld [vmem:[%s787_s19 + $0xe] sm:$0x3]  ;;  %v257_v1 = vld [vmem:[%s787_s19] sm:$0x3]  ;;  %s687_s20 = smov 120  }
  0x32   : > { %327 = vrot.lane.b32.xlu1 %v261_v0, %s687_s20  ;;  %269 = vrot.lane.b32.xlu0 %v257_v1, %s687_s20  ;;  %s688_s21 = smov 8   ;;  %v258_v2 = vld [vmem:[%s787_s19 + $0x10] sm:$0x3]  ;;  %v262_v3 = vld [vmem:[%s787_s19 + $0x1e] sm:$0x3]  ;;  %s689_s15 = smov 3  }
  0x33   : > { %v259_v4 = vld [vmem:[%s787_s19 + $0x20] sm:$0x3]  ;;  %v263_v5 = vld [vmem:[%s787_s19 + $0x2e] sm:$0x3]  ;;  %v260_v6 = vld [vmem:[%s787_s19 + $0x30] sm:$0x3] }
  0x34   : > { %v264_v7 = vld [vmem:[%s787_s19 + $0x3e] sm:$0x3]  ;;  %v143_v8 = vld [vmem:[%s787_s19 + $0x8] sm:$0xff]  ;;  %v142_v9 = vld [vmem:[%s787_s19] sm:$0xff]  ;;  %s690_s22 = smov 115   ;;  %s691_s23 = smov 19  }
  0x35   : > { %v145_v10 = vld [vmem:[%s787_s19 + $0x18] sm:$0xff]  ;;  %v144_v11 = vld [vmem:[%s787_s19 + $0x10] sm:$0xff]  ;;  %v147_v12 = vld [vmem:[%s787_s19 + $0x28] sm:$0xff]  ;;  %vm293_vm0 = vcmask 64512   ;;  %vm318_vm1 = vcmask 1040384   ;;  %s565_s24 = sshll.u32 %s555_s10, 2 }
  0x36   : > { %339 = vrot.lane.b32.xlu1 %v261_v0, %s688_s21  ;;  %281 = vrot.lane.b32.xlu0 %v257_v1, %s688_s21  ;;  %v146_v13 = vld [vmem:[%s787_s19 + $0x20] sm:$0xff]  ;;  %v149_v14 = vld [vmem:[%s787_s19 + $0x38] sm:$0xff]  ;;  %p136_p7 = scmp.lt.s32.totalorder %s565_s24, 7  ;;  %vm182_vm2 = vcmask 154648   ;;  %vm215_vm3 = vcmask 23552   ;;  %vm248_vm4 = vcmask 179352  }
  0x37   : > { %v148_v15 = vld [vmem:[%s787_s19 + $0x30] sm:$0xff]  ;;  %vm395_vm5 = vcmask 148504   ;;  %vm412_vm6 = vcmask 17408   ;;  %vm429_vm7 = vcmask 173208  }
  0x38   : > { %s1024_s24 = smov (!%p136_p7, %s565_s24), 7 }
  0x39   : > { %s571_s9 = smul.u32 24, %s1024_s24 }
  0x3a   : > { %283 = vrot.lane.b32.xlu1 %v258_v2, %s688_s21  ;;  %271 = vrot.lane.b32.xlu0 %v258_v2, %s687_s20 }
  0x3b   : > { %s875_s26 = scalar_lea.vmem %s1015_s1, %s571_s9 }
  0x3e   : > { %341 = vrot.lane.b32.xlu1 %v262_v3, %s688_s21  ;;  %329 = vrot.lane.b32.xlu0 %v262_v3, %s687_s20 }
  0x42   : > { %285 = vrot.lane.b32.xlu1 %v259_v4, %s688_s21  ;;  %273 = vrot.lane.b32.xlu0 %v259_v4, %s687_s20 }
  0x46   : > { %343 = vrot.lane.b32.xlu1 %v263_v5, %s688_s21  ;;  %331 = vrot.lane.b32.xlu0 %v263_v5, %s687_s20 }
  0x4a   : > { %287 = vrot.lane.b32.xlu1 %v260_v6, %s688_s21  ;;  %275 = vrot.lane.b32.xlu0 %v260_v6, %s687_s20 }
  0x4e   : > { %345 = vrot.lane.b32.xlu1 %v264_v7, %s688_s21  ;;  %333 = vrot.lane.b32.xlu0 %v264_v7, %s687_s20 }
  0x52   : > { %160 = vrot.lane.b32.xlu1 %v143_v8, %s689_s15  ;;  %158 = vrot.lane.b32.xlu0 %v142_v9, %s689_s15 }
  0x56   : > { %164 = vrot.lane.b32.xlu1 %v145_v10, %s689_s15  ;;  %162 = vrot.lane.b32.xlu0 %v144_v11, %s689_s15 }
  0x5a   : > { %168 = vrot.lane.b32.xlu1 %v147_v12, %s689_s15  ;;  %166 = vrot.lane.b32.xlu0 %v146_v13, %s689_s15 }
  0x5e   : > { %172 = vrot.lane.b32.xlu1 %v149_v14, %s689_s15  ;;  %170 = vrot.lane.b32.xlu0 %v148_v15, %s689_s15 }
  0x62   : > { %193 = vrot.lane.b32.xlu1 %v143_v8, %s690_s22  ;;  %191 = vrot.lane.b32.xlu0 %v142_v9, %s690_s22 }
  0x66   : > { %197 = vrot.lane.b32.xlu1 %v145_v10, %s690_s22  ;;  %195 = vrot.lane.b32.xlu0 %v144_v11, %s690_s22 }
  0x6a   : > { %201 = vrot.lane.b32.xlu1 %v147_v12, %s690_s22  ;;  %199 = vrot.lane.b32.xlu0 %v146_v13, %s690_s22 }
  0x6e   : > { %205 = vrot.lane.b32.xlu1 %v149_v14, %s690_s22  ;;  %203 = vrot.lane.b32.xlu0 %v148_v15, %s690_s22 }
  0x72   : > { %226 = vrot.lane.b32.xlu1 %v143_v8, %s691_s23  ;;  %224 = vrot.lane.b32.xlu0 %v142_v9, %s691_s23 }
  0x76   : > { %230 = vrot.lane.b32.xlu1 %v145_v10, %s691_s23  ;;  %228 = vrot.lane.b32.xlu0 %v144_v11, %s691_s23 }
  0x7a   : > { %234 = vrot.lane.b32.xlu1 %v147_v12, %s691_s23  ;;  %232 = vrot.lane.b32.xlu0 %v146_v13, %s691_s23 }
  0x7e   : > { %238 = vrot.lane.b32.xlu1 %v149_v14, %s691_s23  ;;  %236 = vrot.lane.b32.xlu0 %v148_v15, %s691_s23 }
  0xa4   : > { %v328_v16 = vpop.permute.xlu1 %327  ;;  %v270_v17 = vpop.permute.xlu0 %269 }
  0xa8   : > { %v340_v18 = vpop.permute.xlu1 %339  ;;  %v282_v19 = vpop.permute.xlu0 %281 }
  0xa9   : > { %v351_v20 = vsel %vm293_vm0, %v328_v16, %v340_v18  ;;  %v294_v21 = vsel %vm293_vm0, %v270_v17, %v282_v19 }
  0xaa   : > { %v359_v22 = vrot.slane %v351_v20, 1  ;;  %v367_v23 = vrot.slane %v351_v20, 7  ;;  %v302_v24 = vrot.slane %v294_v21, 1  ;;  %v310_v25 = vrot.slane %v294_v21, 7 }
  0xac   : > { %v284_v26 = vpop.permute.xlu1 %283  ;;  %v272_v27 = vpop.permute.xlu0 %271  ;;  %v836_v28 = vsel %vm318_vm1, %v359_v22, %v367_v23  ;;  %v839_v29 = vsel %vm318_vm1, %v302_v24, %v310_v25 }
  0xad   : > { %v295_v30 = vsel %vm293_vm0, %v272_v27, %v284_v26  ;;  %438 = vrot.lane.b32.xlu1 %v836_v28, %s689_s15  ;;  %383 = vrot.lane.b32.xlu0 %v839_v29, %s689_s15 }
  0xae   : > { %v303_v31 = vrot.slane %v295_v30, 1  ;;  %v311_v32 = vrot.slane %v295_v30, 7 }
  0xb0   : > { %v342_v33 = vpop.permute.xlu1 %341  ;;  %v330_v34 = vpop.permute.xlu0 %329  ;;  %v847_v35 = vsel %vm318_vm1, %v303_v31, %v311_v32 }
  0xb1   : > { %v352_v36 = vsel %vm293_vm0, %v330_v34, %v342_v33  ;;  %385 = vrot.lane.b32.xlu0 %v847_v35, %s689_s15 }
  0xb2   : > { %v360_v37 = vrot.slane %v352_v36, 1  ;;  %v368_v38 = vrot.slane %v352_v36, 7 }
  0xb4   : > { %v286_v39 = vpop.permute.xlu1 %285  ;;  %v274_v40 = vpop.permute.xlu0 %273  ;;  %v855_v41 = vsel %vm318_vm1, %v360_v37, %v368_v38 }
  0xb5   : > { %v296_v42 = vsel %vm293_vm0, %v274_v40, %v286_v39  ;;  %440 = vrot.lane.b32.xlu1 %v855_v41, %s689_s15 }
  0xb6   : > { %v304_v43 = vrot.slane %v296_v42, 1  ;;  %v312_v44 = vrot.slane %v296_v42, 7 }
  0xb8   : > { %v344_v45 = vpop.permute.xlu1 %343  ;;  %v332_v46 = vpop.permute.xlu0 %331  ;;  %v861_v47 = vsel %vm318_vm1, %v304_v43, %v312_v44 }
  0xb9   : > { %v353_v48 = vsel %vm293_vm0, %v332_v46, %v344_v45  ;;  %387 = vrot.lane.b32.xlu0 %v861_v47, %s689_s15 }
  0xba   : > { %v361_v49 = vrot.slane %v353_v48, 1  ;;  %v369_v50 = vrot.slane %v353_v48, 7 }
  0xbc   : > { %v288_v51 = vpop.permute.xlu1 %287  ;;  %v276_v52 = vpop.permute.xlu0 %275  ;;  %v377_v53 = vsel %vm318_vm1, %v361_v49, %v369_v50 }
  0xbd   : > { %v297_v54 = vsel %vm293_vm0, %v276_v52, %v288_v51  ;;  %442 = vrot.lane.b32.xlu1 %v377_v53, %s689_s15 }
  0xbe   : > { %v305_v55 = vrot.slane %v297_v54, 1  ;;  %v313_v56 = vrot.slane %v297_v54, 7 }
  0xc0   : > { %v346_v57 = vpop.permute.xlu1 %345  ;;  %v334_v58 = vpop.permute.xlu0 %333  ;;  %v322_v59 = vsel %vm318_vm1, %v305_v55, %v313_v56 }
  0xc1   : > { %v354_v60 = vsel %vm293_vm0, %v334_v58, %v346_v57  ;;  %389 = vrot.lane.b32.xlu0 %v322_v59, %s689_s15 }
  0xc2   : > { %v362_v61 = vrot.slane %v354_v60, 1  ;;  %v370_v62 = vrot.slane %v354_v60, 7 }
  0xc4   : > { %v378_v63 = vsel %vm318_vm1, %v362_v61, %v370_v62  ;;  %v161_v0 = vpop.permute.xlu1 %160  ;;  %v159_v1 = vpop.permute.xlu0 %158 }
  0xc5   : > { %444 = vrot.lane.b32.xlu1 %v378_v63, %s689_s15  ;;  %400 = vrot.lane.b32.xlu0 %v839_v29, %s690_s22  ;;  %184 = vst.msk [vmem:[%s875_s26 + $0xa] sm:$0xff] %vm182_vm2, %v161_v0  ;;  %183 = vst.msk [vmem:[%s875_s26 + $0x2] sm:$0xff] %vm182_vm2, %v159_v1 }
  0xc8   : > { %v165_v2 = vpop.permute.xlu1 %164  ;;  %v163_v3 = vpop.permute.xlu0 %162 }
  0xc9   : > { %454 = vrot.lane.b32.xlu1 %v836_v28, %s690_s22  ;;  %402 = vrot.lane.b32.xlu0 %v847_v35, %s690_s22  ;;  %186 = vst.msk [vmem:[%s875_s26 + $0x22] sm:$0xff] %vm182_vm2, %v165_v2  ;;  %185 = vst.msk [vmem:[%s875_s26 + $0x1a] sm:$0xff] %vm182_vm2, %v163_v3 }
  0xcc   : > { %v169_v4 = vpop.permute.xlu1 %168  ;;  %v167_v5 = vpop.permute.xlu0 %166 }
  0xcd   : > { %456 = vrot.lane.b32.xlu1 %v855_v41, %s690_s22  ;;  %404 = vrot.lane.b32.xlu0 %v861_v47, %s690_s22  ;;  %188 = vst.msk [vmem:[%s875_s26 + $0x3a] sm:$0xff] %vm182_vm2, %v169_v4  ;;  %187 = vst.msk [vmem:[%s875_s26 + $0x32] sm:$0xff] %vm182_vm2, %v167_v5 }
  0xd0   : > { %v173_v6 = vpop.permute.xlu1 %172  ;;  %v171_v7 = vpop.permute.xlu0 %170 }
  0xd1   : > { %458 = vrot.lane.b32.xlu1 %v377_v53, %s690_s22  ;;  %406 = vrot.lane.b32.xlu0 %v322_v59, %s690_s22  ;;  %190 = vst.msk [vmem:[%s875_s26 + $0x52] sm:$0xff] %vm182_vm2, %v173_v6  ;;  %189 = vst.msk [vmem:[%s875_s26 + $0x4a] sm:$0xff] %vm182_vm2, %v171_v7 }
  0xd4   : > { %v194_v8 = vpop.permute.xlu1 %193  ;;  %v192_v9 = vpop.permute.xlu0 %191 }
  0xd5   : > { %460 = vrot.lane.b32.xlu1 %v378_v63, %s690_s22  ;;  %417 = vrot.lane.b32.xlu0 %v839_v29, %s691_s23  ;;  %217 = vst.msk [vmem:[%s875_s26 + $0xa] sm:$0xff] %vm215_vm3, %v194_v8  ;;  %216 = vst.msk [vmem:[%s875_s26 + $0x2] sm:$0xff] %vm215_vm3, %v192_v9 }
  0xd8   : > { %v198_v10 = vpop.permute.xlu1 %197  ;;  %v196_v11 = vpop.permute.xlu0 %195 }
  0xd9   : > { %470 = vrot.lane.b32.xlu1 %v836_v28, %s691_s23  ;;  %419 = vrot.lane.b32.xlu0 %v847_v35, %s691_s23  ;;  %219 = vst.msk [vmem:[%s875_s26 + $0x22] sm:$0xff] %vm215_vm3, %v198_v10  ;;  %218 = vst.msk [vmem:[%s875_s26 + $0x1a] sm:$0xff] %vm215_vm3, %v196_v11 }
  0xdc   : > { %v202_v12 = vpop.permute.xlu1 %201  ;;  %v200_v13 = vpop.permute.xlu0 %199 }
  0xdd   : > { %472 = vrot.lane.b32.xlu1 %v855_v41, %s691_s23  ;;  %421 = vrot.lane.b32.xlu0 %v861_v47, %s691_s23  ;;  %221 = vst.msk [vmem:[%s875_s26 + $0x3a] sm:$0xff] %vm215_vm3, %v202_v12  ;;  %220 = vst.msk [vmem:[%s875_s26 + $0x32] sm:$0xff] %vm215_vm3, %v200_v13 }
  0xe0   : > { %v206_v14 = vpop.permute.xlu1 %205  ;;  %v204_v15 = vpop.permute.xlu0 %203 }
  0xe1   : > { %474 = vrot.lane.b32.xlu1 %v377_v53, %s691_s23  ;;  %423 = vrot.lane.b32.xlu0 %v322_v59, %s691_s23  ;;  %223 = vst.msk [vmem:[%s875_s26 + $0x52] sm:$0xff] %vm215_vm3, %v206_v14  ;;  %222 = vst.msk [vmem:[%s875_s26 + $0x4a] sm:$0xff] %vm215_vm3, %v204_v15 }
  0xe4   : > { %v227_v16 = vpop.permute.xlu1 %226  ;;  %v225_v17 = vpop.permute.xlu0 %224 }
  0xe5   : > { %476 = vrot.lane.b32.xlu1 %v378_v63, %s691_s23  ;;  %250 = vst.msk [vmem:[%s875_s26 + $0xa] sm:$0xff] %vm248_vm4, %v227_v16  ;;  %249 = vst.msk [vmem:[%s875_s26 + $0x2] sm:$0xff] %vm248_vm4, %v225_v17 }
  0xe8   : > { %v231_v18 = vpop.permute.xlu1 %230  ;;  %v229_v19 = vpop.permute.xlu0 %228 }
  0xe9   : > { %252 = vst.msk [vmem:[%s875_s26 + $0x22] sm:$0xff] %vm248_vm4, %v231_v18  ;;  %251 = vst.msk [vmem:[%s875_s26 + $0x1a] sm:$0xff] %vm248_vm4, %v229_v19 }
  0xec   : > { %v235_v20 = vpop.permute.xlu1 %234  ;;  %v233_v21 = vpop.permute.xlu0 %232 }
  0xed   : > { %254 = vst.msk [vmem:[%s875_s26 + $0x3a] sm:$0xff] %vm248_vm4, %v235_v20  ;;  %253 = vst.msk [vmem:[%s875_s26 + $0x32] sm:$0xff] %vm248_vm4, %v233_v21 }
  0xf0   : > { %v239_v22 = vpop.permute.xlu1 %238  ;;  %v237_v23 = vpop.permute.xlu0 %236 }
  0xf1   : > { %256 = vst.msk [vmem:[%s875_s26 + $0x52] sm:$0xff] %vm248_vm4, %v239_v22  ;;  %255 = vst.msk [vmem:[%s875_s26 + $0x4a] sm:$0xff] %vm248_vm4, %v237_v23 }
 0x11f   : > { %v439_v24 = vpop.permute.xlu1 %438  ;;  %v384_v25 = vpop.permute.xlu0 %383 }
 0x120   : > { %450 = vst.msk [vmem:[%s875_s26 + $0x12] sm:$0x3] %vm395_vm5, %v439_v24  ;;  %396 = vst.msk [vmem:[%s875_s26] sm:$0x3] %vm395_vm5, %v384_v25 }
 0x123   : > { %v386_v26 = vpop.permute.xlu0 %385 }
 0x124   : > { %397 = vst.msk [vmem:[%s875_s26 + $0x18] sm:$0x3] %vm395_vm5, %v386_v26 }
 0x127   : > { %v441_v27 = vpop.permute.xlu1 %440 }
 0x128   : > { %451 = vst.msk [vmem:[%s875_s26 + $0x2a] sm:$0x3] %vm395_vm5, %v441_v27 }
 0x12b   : > { %v388_v28 = vpop.permute.xlu0 %387 }
 0x12c   : > { %398 = vst.msk [vmem:[%s875_s26 + $0x30] sm:$0x3] %vm395_vm5, %v388_v28 }
 0x12f   : > { %v443_v29 = vpop.permute.xlu1 %442 }
 0x130   : > { %452 = vst.msk [vmem:[%s875_s26 + $0x42] sm:$0x3] %vm395_vm5, %v443_v29 }
 0x133   : > { %v390_v30 = vpop.permute.xlu0 %389 }
 0x134   : > { %399 = vst.msk [vmem:[%s875_s26 + $0x48] sm:$0x3] %vm395_vm5, %v390_v30 }
 0x137   : > { %v445_v31 = vpop.permute.xlu1 %444  ;;  %v401_v32 = vpop.permute.xlu0 %400 }
 0x138   : > { %453 = vst.msk [vmem:[%s875_s26 + $0x5a] sm:$0x3] %vm395_vm5, %v445_v31 }
 0x139   : > { %413 = vst.msk [vmem:[%s875_s26] sm:$0x3] %vm412_vm6, %v401_v32 }
 0x13b   : > { %v455_v33 = vpop.permute.xlu1 %454  ;;  %v403_v34 = vpop.permute.xlu0 %402 }
 0x13c   : > { %466 = vst.msk [vmem:[%s875_s26 + $0x12] sm:$0x3] %vm412_vm6, %v455_v33  ;;  %414 = vst.msk [vmem:[%s875_s26 + $0x18] sm:$0x3] %vm412_vm6, %v403_v34 }
 0x13f   : > { %v457_v35 = vpop.permute.xlu1 %456  ;;  %v405_v36 = vpop.permute.xlu0 %404 }
 0x140   : > { %467 = vst.msk [vmem:[%s875_s26 + $0x2a] sm:$0x3] %vm412_vm6, %v457_v35  ;;  %415 = vst.msk [vmem:[%s875_s26 + $0x30] sm:$0x3] %vm412_vm6, %v405_v36 }
 0x143   : > { %v459_v37 = vpop.permute.xlu1 %458  ;;  %v407_v38 = vpop.permute.xlu0 %406 }
 0x144   : > { %468 = vst.msk [vmem:[%s875_s26 + $0x42] sm:$0x3] %vm412_vm6, %v459_v37  ;;  %416 = vst.msk [vmem:[%s875_s26 + $0x48] sm:$0x3] %vm412_vm6, %v407_v38 }
 0x147   : > { %v461_v39 = vpop.permute.xlu1 %460  ;;  %v418_v40 = vpop.permute.xlu0 %417 }
 0x148   : > { %469 = vst.msk [vmem:[%s875_s26 + $0x5a] sm:$0x3] %vm412_vm6, %v461_v39 }
 0x149   : > { %430 = vst.msk [vmem:[%s875_s26] sm:$0x3] %vm429_vm7, %v418_v40 }
 0x14b   : > { %v471_v41 = vpop.permute.xlu1 %470  ;;  %v420_v42 = vpop.permute.xlu0 %419 }
 0x14c   : > { %482 = vst.msk [vmem:[%s875_s26 + $0x12] sm:$0x3] %vm429_vm7, %v471_v41  ;;  %431 = vst.msk [vmem:[%s875_s26 + $0x18] sm:$0x3] %vm429_vm7, %v420_v42 }
 0x14f   : > { %v473_v43 = vpop.permute.xlu1 %472  ;;  %v422_v44 = vpop.permute.xlu0 %421 }
 0x150   : > { %483 = vst.msk [vmem:[%s875_s26 + $0x2a] sm:$0x3] %vm429_vm7, %v473_v43  ;;  %432 = vst.msk [vmem:[%s875_s26 + $0x30] sm:$0x3] %vm429_vm7, %v422_v44 }
 0x153   : > { %v475_v45 = vpop.permute.xlu1 %474  ;;  %v424_v46 = vpop.permute.xlu0 %423 }
 0x154   : > { %484 = vst.msk [vmem:[%s875_s26 + $0x42] sm:$0x3] %vm429_vm7, %v475_v45  ;;  %433 = vst.msk [vmem:[%s875_s26 + $0x48] sm:$0x3] %vm429_vm7, %v424_v46 }
 0x157   : > { %v477_v47 = vpop.permute.xlu1 %476 }
 0x158   : > { %485 = vst.msk [vmem:[%s875_s26 + $0x5a] sm:$0x3] %vm429_vm7, %v477_v47 }
 0x159 PF: > { %p11_p8 = scmp.ge.s32.totalorder %s722_s11, 4   ;;  %s1019_s6 = smov %s674_s7 }
 0x15a   : > { %s1020_s7 = smov %s678_s8  ;;  %s1021_s8 = smov %s732_s14 }
 0x15b   : > { %s1022_s9 = smov %s722_s11  ;;  %13 = sbr.rel (!%p11_p8) target bundleno = 3 (0x3), region = 64 }
 0x162   :  { %510 = vsyncpa [#allocation3], 1 }
 0x163   :  { %512 = vsyncpa [#allocation3 + $0x1], 1 }

</bundles_post_ra>
